<compile_context>
chip_gen: v7x
topology: tpu7x:2x2x1
jax: 0.10.0
libtpu: 0.0.40
codegen_flags: <defaults>
</compile_context>

<pallas_src>
import functools
import math

import jax
import jax.numpy as jnp
from jax.experimental import pallas as pl
from jax.experimental.pallas import tpu as pltpu


def _round_up(x, m):
    return (x + m - 1) // m * m


def _pick_row_tile(M, row_tile):
    """Sublane-aligned (x8) row tile; balanced so padded-row waste < 8/tile."""
    if M <= row_tile:
        return _round_up(M, 8)
    n_tiles = -(-M // row_tile)              # ceil(M / row_tile)
    return _round_up(-(-M // n_tiles), 8)    # round_up(ceil(M / n_tiles), 8)


def _make_mlp_kernel(num_layers):
    """Fused MLP kernel.

    Ref order: x, w0, b0, w1, b1, ..., w_{L-1}, b_{L-1}, out.
    Hidden layers: Linear -> ReLU; final layer: Linear only.
    """

    def kernel(*refs):
        x_ref = refs[0]
        o_ref = refs[-1]
        h = x_ref[...]                                   # bf16 (tm, K0_pad)
        acc = None
        for li in range(num_layers):
            w_ref = refs[1 + 2 * li]
            b_ref = refs[2 + 2 * li]
            acc = jnp.dot(h, w_ref[...], preferred_element_type=jnp.float32)
            acc = acc + b_ref[...]                       # f32 bias broadcast
            if li < num_layers - 1:
                h = jnp.maximum(acc, 0.0).astype(jnp.bfloat16)   # ReLU, bf16 for MXU
        o_ref[...] = acc.astype(o_ref.dtype)

    return kernel


@functools.partial(jax.jit, static_argnames=("z_dim", "use_z_t_minus_1", "row_tile"))
def ar_dkf_latent_state_transition(
    z_t_minus_1, h_x_t_minus_1, weights, biases, *,
    z_dim, use_z_t_minus_1=True, row_tile=256,
):
    """Pallas forward of AR_DKF_LatentStateTransition.

    z_t_minus_1   : (seq_len, batch, z_dim) or None
    h_x_t_minus_1 : (seq_len, batch, h_x_dim)
    weights       : list of (in_i, out_i) f32  (last out_i == 2*z_dim)
    biases        : list of (out_i,) f32
    returns       : (mean, logvar) each (seq_len, batch, z_dim), f32
    """
    if use_z_t_minus_1:
        zx = jnp.concatenate([z_t_minus_1, h_x_t_minus_1], axis=-1)
    else:
        zx = h_x_t_minus_1
    seq_len, batch, in_dim = zx.shape
    M = seq_len * batch
    x = zx.reshape(M, in_dim)

    num_layers = len(weights)
    out_dim = weights[-1].shape[1]                      # 2 * z_dim

    # ---- lane-dense padding (features -> x128), balanced row tiling ----------
    in_pad = _round_up(in_dim, 128)
    n_pads = [_round_up(w.shape[1], 128) for w in weights]
    out_pad = n_pads[-1]

    tm = _pick_row_tile(M, row_tile)
    M_pad = _round_up(M, tm)

    x_p = jnp.zeros((M_pad, in_pad), jnp.bfloat16)
    x_p = x_p.at[:M, :in_dim].set(x.astype(jnp.bfloat16))

    w_p, b_p = [], []
    k_prev_pad = in_pad
    for w, b, n_pad in zip(weights, biases, n_pads):
        k, n = w.shape
        wp = jnp.zeros((k_prev_pad, n_pad), jnp.bfloat16)
        wp = wp.at[:k, :n].set(w.astype(jnp.bfloat16))   # padded rows/cols stay zero
        bp = jnp.zeros((1, n_pad), jnp.float32)
        bp = bp.at[0, :n].set(b.astype(jnp.float32))
        w_p.append(wp)
        b_p.append(bp)
        k_prev_pad = n_pad

    # ---- BlockSpecs: row-tiled activations, resident weights/biases ---------
    in_specs = [pl.BlockSpec((tm, in_pad), lambda i: (i, 0))]
    for wp, bp in zip(w_p, b_p):
        in_specs.append(pl.BlockSpec(wp.shape, lambda i: (0, 0)))   # DMA once, resident
        in_specs.append(pl.BlockSpec(bp.shape, lambda i: (0, 0)))
    out_specs = pl.BlockSpec((tm, out_pad), lambda i: (i, 0))

    # ---- cost estimate + VMEM budget (sized for v7x 64 MiB) ------------------
    flops = sum(2 * M * w.shape[0] * w.shape[1] for w in weights)
    weight_bytes = (sum(math.prod(w.shape) * 2 for w in w_p)
                    + sum(math.prod(b.shape) * 4 for b in b_p))
    io_bytes = M_pad * in_pad * 2 + M_pad * out_pad * 4 + weight_bytes
    cost = pl.CostEstimate(flops=flops, transcendentals=0, bytes_accessed=io_bytes)

    widest = max([in_pad] + n_pads)
    tile_bytes = 2 * (tm * in_pad * 2 + tm * out_pad * 4)          # double-buffered I/O tiles
    scratch_bytes = 2 * tm * widest * 4 * num_layers               # layer intermediates
    vmem_limit = int(min(max(tile_bytes + weight_bytes + scratch_bytes + (4 << 20),
                             8 << 20), 32 << 20))

    kernel = _make_mlp_kernel(num_layers)
    args = [x_p]
    for wp, bp in zip(w_p, b_p):
        args += [wp, bp]

    out = pl.pallas_call(
        kernel,
        out_shape=jax.ShapeDtypeStruct((M_pad, out_pad), jnp.float32),
        grid=(M_pad // tm,),
        in_specs=in_specs,
        out_specs=out_specs,
        compiler_params=pltpu.CompilerParams(
            dimension_semantics=("parallel",),
            vmem_limit_bytes=vmem_limit,
        ),
        cost_estimate=cost,
    )(*args)

    h = out[:M, :out_dim].reshape(seq_len, batch, out_dim)
    z_mean = h[..., :z_dim]
    z_logvar = h[..., z_dim:]
    return z_mean, z_logvar


def init_mlp_params(key, z_dim, h_x_dim, layers_dim, use_z_t_minus_1=True):
    """Deterministic init mimicking nn.Linear defaults (U(-1/sqrt(fan_in), ...))."""
    input_dim = z_dim + h_x_dim if use_z_t_minus_1 else h_x_dim
    dims = list(layers_dim) + [2 * z_dim]
    weights, biases = [], []
    in_d = input_dim
    for d in dims:
        key, kw, kb = jax.random.split(key, 3)
        bound = 1.0 / math.sqrt(in_d)
        weights.append(jax.random.uniform(kw, (in_d, d), jnp.float32, -bound, bound))
        biases.append(jax.random.uniform(kb, (d,), jnp.float32, -bound, bound))
        in_d = d
    return weights, biases


def _ref_forward(zx, weights, biases, *, bf16_operands):
    """Pure-JAX reference (optionally with the same bf16 operand casting)."""
    h = zx.reshape(-1, zx.shape[-1])
    if bf16_operands:
        h = h.astype(jnp.bfloat16)
    for i, (w, b) in enumerate(zip(weights, biases)):
        wop = w.astype(jnp.bfloat16) if bf16_operands else w
        acc = jnp.dot(h, wop, preferred_element_type=jnp.float32) + b
        if i < len(weights) - 1:
            h = jnp.maximum(acc, 0.0)
            if bf16_operands:
                h = h.astype(jnp.bfloat16)
        else:
            h = acc
    return h.reshape(*zx.shape[:-1], -1)


if __name__ == "__main__":
    # Small shapes consistent with the module's forward() contract.
    seq_len, batch = 8, 4
    z_dim, h_x_dim = 16, 24
    layers_dim = [32, 48]
    use_z = True

    key = jax.random.PRNGKey(0)
    kz, kh, kp = jax.random.split(key, 3)
    z_tm1 = jax.random.normal(kz, (seq_len, batch, z_dim), jnp.float32)
    h_x_tm1 = jax.random.normal(kh, (seq_len, batch, h_x_dim), jnp.float32)
    weights, biases = init_mlp_params(kp, z_dim, h_x_dim, layers_dim, use_z)

    z_mean, z_logvar = ar_dkf_latent_state_transition(
        z_tm1, h_x_tm1, weights, biases, z_dim=z_dim, use_z_t_minus_1=use_z)
    z_mean, z_logvar = jax.block_until_ready((z_mean, z_logvar))

    assert z_mean.shape == (seq_len, batch, z_dim)
    assert z_logvar.shape == (seq_len, batch, z_dim)

    zx = jnp.concatenate([z_tm1, h_x_tm1], axis=-1)
    got = jnp.concatenate([z_mean, z_logvar], axis=-1)
    ref_bf16 = _ref_forward(zx, weights, biases, bf16_operands=True)
    ref_f32 = _ref_forward(zx, weights, biases, bf16_operands=False)

    # Tight check against the dtype-matched reference, loose sanity vs pure f32.
    assert jnp.allclose(got, ref_bf16, atol=2e-3, rtol=2e-3), \
        float(jnp.max(jnp.abs(got - ref_bf16)))
    assert jnp.allclose(got, ref_f32, atol=5e-2, rtol=5e-2), \
        float(jnp.max(jnp.abs(got - ref_f32)))

    print("KERNEL_OK")
</pallas_src>

<mosaic_0001>
module attributes {stable_mosaic.version = 11 : i64} {
  func.func @kernel(%arg0: i32, %arg1: memref<32x128xbf16, #tpu.memory_space<vmem>>, %arg2: memref<128x128xbf16, #tpu.memory_space<vmem>>, %arg3: memref<1x128xf32, #tpu.memory_space<vmem>>, %arg4: memref<128x128xbf16, #tpu.memory_space<vmem>>, %arg5: memref<1x128xf32, #tpu.memory_space<vmem>>, %arg6: memref<128x128xbf16, #tpu.memory_space<vmem>>, %arg7: memref<1x128xf32, #tpu.memory_space<vmem>>, %arg8: memref<32x128xf32, #tpu.memory_space<vmem>>) attributes {dimension_semantics = [#tpu.dimension_semantics<parallel>], iteration_bounds = array<i64: 1>, scalar_prefetch = 0 : i64, scratch_operands = 0 : i64, tpu.core_type = #tpu.core_type<tc>, window_params = [{transform_indices = @transform_0, window_bounds = array<i64: 32, 128>}, {pipeline_mode = #tpu.pipeline_mode<synchronous>, transform_indices = @transform_1, window_bounds = array<i64: 128, 128>}, {pipeline_mode = #tpu.pipeline_mode<synchronous>, transform_indices = @transform_2, window_bounds = array<i64: 1, 128>}, {pipeline_mode = #tpu.pipeline_mode<synchronous>, transform_indices = @transform_3, window_bounds = array<i64: 128, 128>}, {pipeline_mode = #tpu.pipeline_mode<synchronous>, transform_indices = @transform_4, window_bounds = array<i64: 1, 128>}, {pipeline_mode = #tpu.pipeline_mode<synchronous>, transform_indices = @transform_5, window_bounds = array<i64: 128, 128>}, {pipeline_mode = #tpu.pipeline_mode<synchronous>, transform_indices = @transform_6, window_bounds = array<i64: 1, 128>}, {transform_indices = @transform_7, window_bounds = array<i64: 32, 128>}]} {
    %c0 = arith.constant 0 : index
    %c0_0 = arith.constant 0 : index
    %0 = vector.load %arg1[%c0, %c0_0] : memref<32x128xbf16, #tpu.memory_space<vmem>>, vector<32x128xbf16>
    %c0_1 = arith.constant 0 : index
    %c0_2 = arith.constant 0 : index
    %1 = vector.load %arg2[%c0_1, %c0_2] : memref<128x128xbf16, #tpu.memory_space<vmem>>, vector<128x128xbf16>
    %cst = arith.constant dense<0.000000e+00> : vector<32x128xf32>
    %2 = tpu.matmul %0, %1, %cst {dimension_numbers = #tpu.dot_dimension_numbers<[1], [0], [0], [1], [0, 0, 1, 1], [], []>} : vector<32x128xbf16>, vector<128x128xbf16>, vector<32x128xf32> -> vector<32x128xf32>
    %c0_3 = arith.constant 0 : index
    %c0_4 = arith.constant 0 : index
    %3 = vector.load %arg3[%c0_3, %c0_4] : memref<1x128xf32, #tpu.memory_space<vmem>>, vector<1x128xf32>
    %4 = vector.broadcast %3 : vector<1x128xf32> to vector<32x128xf32>
    %5 = arith.addf %2, %4 : vector<32x128xf32>
    %cst_5 = arith.constant 0.000000e+00 : f32
    %6 = vector.broadcast %cst_5 : f32 to vector<32x128xf32>
    %7 = arith.maximumf %5, %6 : vector<32x128xf32>
    %8 = arith.truncf %7 : vector<32x128xf32> to vector<32x128xbf16>
    %c0_6 = arith.constant 0 : index
    %c0_7 = arith.constant 0 : index
    %9 = vector.load %arg4[%c0_6, %c0_7] : memref<128x128xbf16, #tpu.memory_space<vmem>>, vector<128x128xbf16>
    %cst_8 = arith.constant dense<0.000000e+00> : vector<32x128xf32>
    %10 = tpu.matmul %8, %9, %cst_8 {dimension_numbers = #tpu.dot_dimension_numbers<[1], [0], [0], [1], [0, 0, 1, 1], [], []>} : vector<32x128xbf16>, vector<128x128xbf16>, vector<32x128xf32> -> vector<32x128xf32>
    %c0_9 = arith.constant 0 : index
    %c0_10 = arith.constant 0 : index
    %11 = vector.load %arg5[%c0_9, %c0_10] : memref<1x128xf32, #tpu.memory_space<vmem>>, vector<1x128xf32>
    %12 = vector.broadcast %11 : vector<1x128xf32> to vector<32x128xf32>
    %13 = arith.addf %10, %12 : vector<32x128xf32>
    %cst_11 = arith.constant 0.000000e+00 : f32
    %14 = vector.broadcast %cst_11 : f32 to vector<32x128xf32>
    %15 = arith.maximumf %13, %14 : vector<32x128xf32>
    %16 = arith.truncf %15 : vector<32x128xf32> to vector<32x128xbf16>
    %c0_12 = arith.constant 0 : index
    %c0_13 = arith.constant 0 : index
    %17 = vector.load %arg6[%c0_12, %c0_13] : memref<128x128xbf16, #tpu.memory_space<vmem>>, vector<128x128xbf16>
    %cst_14 = arith.constant dense<0.000000e+00> : vector<32x128xf32>
    %18 = tpu.matmul %16, %17, %cst_14 {dimension_numbers = #tpu.dot_dimension_numbers<[1], [0], [0], [1], [0, 0, 1, 1], [], []>} : vector<32x128xbf16>, vector<128x128xbf16>, vector<32x128xf32> -> vector<32x128xf32>
    %c0_15 = arith.constant 0 : index
    %c0_16 = arith.constant 0 : index
    %19 = vector.load %arg7[%c0_15, %c0_16] : memref<1x128xf32, #tpu.memory_space<vmem>>, vector<1x128xf32>
    %20 = vector.broadcast %19 : vector<1x128xf32> to vector<32x128xf32>
    %21 = arith.addf %18, %20 : vector<32x128xf32>
    %c0_17 = arith.constant 0 : index
    %c0_18 = arith.constant 0 : index
    %22 = vector.load %arg8[%c0_17, %c0_18] : memref<32x128xf32, #tpu.memory_space<vmem>>, vector<32x128xf32>
    tpu.vector_store %arg8[%c0_17, %c0_18], %21 {strides = array<i32>} : memref<32x128xf32, #tpu.memory_space<vmem>>, vector<32x128xf32>,
    return
  }
  func.func @transform_0(%arg0: i32) -> (i32, i32) {
    %c0_i32 = arith.constant 0 : i32
    %c0_i32_0 = arith.constant 0 : i32
    return %arg0, %c0_i32 : i32, i32
  }
  func.func @transform_1(%arg0: i32) -> (i32, i32) {
    %c0_i32 = arith.constant 0 : i32
    %c0_i32_0 = arith.constant 0 : i32
    %c0_i32_1 = arith.constant 0 : i32
    return %c0_i32, %c0_i32_0 : i32, i32
  }
  func.func @transform_2(%arg0: i32) -> (i32, i32) {
    %c0_i32 = arith.constant 0 : i32
    %c0_i32_0 = arith.constant 0 : i32
    %c0_i32_1 = arith.constant 0 : i32
    return %c0_i32, %c0_i32_0 : i32, i32
  }
  func.func @transform_3(%arg0: i32) -> (i32, i32) {
    %c0_i32 = arith.constant 0 : i32
    %c0_i32_0 = arith.constant 0 : i32
    %c0_i32_1 = arith.constant 0 : i32
    return %c0_i32, %c0_i32_0 : i32, i32
  }
  func.func @transform_4(%arg0: i32) -> (i32, i32) {
    %c0_i32 = arith.constant 0 : i32
    %c0_i32_0 = arith.constant 0 : i32
    %c0_i32_1 = arith.constant 0 : i32
    return %c0_i32, %c0_i32_0 : i32, i32
  }
  func.func @transform_5(%arg0: i32) -> (i32, i32) {
    %c0_i32 = arith.constant 0 : i32
    %c0_i32_0 = arith.constant 0 : i32
    %c0_i32_1 = arith.constant 0 : i32
    return %c0_i32, %c0_i32_0 : i32, i32
  }
  func.func @transform_6(%arg0: i32) -> (i32, i32) {
    %c0_i32 = arith.constant 0 : i32
    %c0_i32_0 = arith.constant 0 : i32
    %c0_i32_1 = arith.constant 0 : i32
    return %c0_i32, %c0_i32_0 : i32, i32
  }
  func.func @transform_7(%arg0: i32) -> (i32, i32) {
    %c0_i32 = arith.constant 0 : i32
    %c0_i32_0 = arith.constant 0 : i32
    return %arg0, %c0_i32 : i32, i32
  }
}

</mosaic_0001>

<bundles_post_ra>
// kernel: ar_dkf_latent_state_transition.1
= control target key start
LH: loop header
LB: loop body
LE: loop exit
PB: predicated region body
PF: predicated region fallthrough
CT: control target
= control target key end

     0   :  { %s707_s1 = inlined_call_operand.vmem [shape: bf16[128,128], index: 1, kind: input, shape index: {}]   ;;  %s708_s0 = inlined_call_operand.vmem [shape: bf16[32,128], index: 0, kind: input, shape index: {}]   ;;  %s709_s3 = inlined_call_operand.vmem [shape: bf16[128,128], index: 3, kind: input, shape index: {}]   ;;  %s710_s5 = inlined_call_operand.vmem [shape: bf16[128,128], index: 5, kind: input, shape index: {}]   ;;  %s711_s2 = inlined_call_operand.vmem [shape: f32[1,128], index: 2, kind: input, shape index: {}]   ;;  %s712_s4 = inlined_call_operand.vmem [shape: f32[1,128], index: 4, kind: input, shape index: {}]   ;;  %s713_s6 = inlined_call_operand.vmem [shape: f32[1,128], index: 6, kind: input, shape index: {}]   ;;  %s714_s7 = inlined_call_operand.vmem [shape: f32[32,128], index: 7, kind: output, shape index: {}]  }
   0x1   :  { %v542_v0 = vld [vmem:[%s707_s1] sm:$0xff]   ;;  %v543_v1 = vld [vmem:[%s707_s1 + $0x8] sm:$0xff]   ;;  %v544_v2 = vld [vmem:[%s707_s1 + $0x10] sm:$0xff]  }
   0x2   :  { %482 = vmatprep.subr.bf16.mxu0 %v542_v0  ;;  %v545_v3 = vld [vmem:[%s707_s1 + $0x18] sm:$0xff]   ;;  %v550_v4 = vld [vmem:[%s708_s0] sm:$0xff]   ;;  %v553_v6 = vld [vmem:[%s709_s3 + $0x8] sm:$0xff]  }
   0x3   :  { %483 = vmatpush3.bf16.msra.mxu0 %v542_v0  ;;  %498 = vmatprep.mubr.bf16.mxu0 %v550_v4  ;;  %v552_v5 = vld [vmem:[%s709_s3] sm:$0xff]   ;;  %v554_v8 = vld [vmem:[%s709_s3 + $0x10] sm:$0xff]   ;;  %v547_v9 = vld [vmem:[%s707_s1 + $0x28] sm:$0xff]  }
   0x4   :  { %484 = vmatprep.subr.bf16.mxu0 %v543_v1  ;;  %v546_v7 = vld [vmem:[%s707_s1 + $0x20] sm:$0xff]   ;;  %502 = vmatprep.subr.bf16.mxu1 %v552_v5  ;;  %v555_v10 = vld [vmem:[%s709_s3 + $0x18] sm:$0xff]   ;;  %v548_v11 = vld [vmem:[%s707_s1 + $0x30] sm:$0xff]  }
   0x5   :  { %503 = vmatpush3.bf16.msra.mxu1 %v552_v5  ;;  %v556_v12 = vld [vmem:[%s709_s3 + $0x20] sm:$0xff]   ;;  %v549_v13 = vld [vmem:[%s707_s1 + $0x38] sm:$0xff]   ;;  %v557_v14 = vld [vmem:[%s709_s3 + $0x28] sm:$0xff]  }
   0x6   :  { %504 = vmatprep.subr.bf16.mxu1 %v553_v6  ;;  %v551_v15 = vld [vmem:[%s708_s0 + $0x8] sm:$0xff]   ;;  %v558_v16 = vld [vmem:[%s709_s3 + $0x30] sm:$0xff]   ;;  %v559_v17 = vld [vmem:[%s709_s3 + $0x38] sm:$0xff]  }
   0x7   :  { %485 = vmatpush3.bf16.msra.mxu0 %v543_v1  ;;  %v560_v18 = vld [vmem:[%s710_s5] sm:$0xff]   ;;  %v561_v19 = vld [vmem:[%s710_s5 + $0x8] sm:$0xff]   ;;  %v562_v20 = vld [vmem:[%s710_s5 + $0x10] sm:$0xff]  }
   0x8   :  { %486 = vmatprep.subr.bf16.mxu0 %v544_v2  ;;  %v563_v21 = vld [vmem:[%s710_s5 + $0x18] sm:$0xff]   ;;  %v564_v22 = vld [vmem:[%s710_s5 + $0x20] sm:$0xff]   ;;  %v565_v23 = vld [vmem:[%s710_s5 + $0x28] sm:$0xff]  }
   0x9   :  { %505 = vmatpush3.bf16.msra.mxu1 %v553_v6  ;;  %v423_v24 = vld [vmem:[%s711_s2] ss:$0 sm:$0xff]  ;;  %v566_v39 = vld [vmem:[%s710_s5 + $0x30] sm:$0xff]   ;;  %v567_v40 = vld [vmem:[%s710_s5 + $0x38] sm:$0xff]  }
   0xa   :  { %506 = vmatprep.subr.bf16.mxu1 %v554_v8  ;;  %v434_v41 = vld [vmem:[%s712_s4] ss:$0 sm:$0xff] }
   0xb   :  { %487 = vmatpush3.bf16.msra.mxu0 %v544_v2  ;;  %v443_v56 = vld [vmem:[%s713_s6] ss:$0 sm:$0xff] }
   0xc   :  { %488 = vmatprep.subr.bf16.mxu0 %v545_v3 }
   0xd   :  { %507 = vmatpush3.bf16.msra.mxu1 %v554_v8 }
   0xe   :  { %508 = vmatprep.subr.bf16.mxu1 %v555_v10 }
   0xf   :  { %489 = vmatpush3.bf16.msra.mxu0 %v545_v3 }
  0x10   :  { %490 = vmatprep.subr.bf16.mxu0 %v546_v7 }
  0x11   :  { %509 = vmatpush3.bf16.msra.mxu1 %v555_v10 }
  0x12   :  { %510 = vmatprep.subr.bf16.mxu1 %v556_v12 }
  0x13   :  { %491 = vmatpush3.bf16.msra.mxu0 %v546_v7 }
  0x14   :  { %492 = vmatprep.subr.bf16.mxu0 %v547_v9 }
  0x15   :  { %511 = vmatpush3.bf16.msra.mxu1 %v556_v12 }
  0x16   :  { %512 = vmatprep.subr.bf16.mxu1 %v557_v14 }
  0x17   :  { %493 = vmatpush3.bf16.msra.mxu0 %v547_v9 }
  0x18   :  { %494 = vmatprep.subr.bf16.mxu0 %v548_v11 }
  0x19   :  { %513 = vmatpush3.bf16.msra.mxu1 %v557_v14 }
  0x1a   :  { %514 = vmatprep.subr.bf16.mxu1 %v558_v16 }
  0x1b   :  { %495 = vmatpush3.bf16.msra.mxu0 %v548_v11 }
  0x1c   :  { %496 = vmatprep.subr.bf16.mxu0 %v549_v13 }
  0x1d   :  { %515 = vmatpush3.bf16.msra.mxu1 %v558_v16 }
  0x1e   :  { %516 = vmatprep.subr.bf16.mxu1 %v559_v17 }
  0x1f   :  { %497 = vmatpush3.bf16.msra.mxu0 %v549_v13 }
  0x20   :  { %522 = vmatprep.subr.bf16.mxu0 %v560_v18 }
  0x21   :  { %517 = vmatpush3.bf16.msra.mxu1 %v559_v17 }
  0x22   :  { %499 = vmatmul.mubr.bf16.vlgmr.msra.gmra.mrb[0].mxu0 %v551_v15 }
  0x23   :  { %523 = vmatpush3.bf16.msra.mxu0 %v560_v18 }
  0x24   :  { %524 = vmatprep.subr.bf16.mxu0 %v561_v19 }
  0x27   :  { %525 = vmatpush3.bf16.msra.mxu0 %v561_v19 }
  0x28   :  { %526 = vmatprep.subr.bf16.mxu0 %v562_v20 }
  0x2b   :  { %527 = vmatpush3.bf16.msra.mxu0 %v562_v20 }
  0x2c   :  { %528 = vmatprep.subr.bf16.mxu0 %v563_v21 }
  0x2f   :  { %529 = vmatpush3.bf16.msra.mxu0 %v563_v21 }
  0x30   :  { %530 = vmatprep.subr.bf16.mxu0 %v564_v22 }
  0x33   :  { %531 = vmatpush3.bf16.msra.mxu0 %v564_v22 }
  0x34   :  { %532 = vmatprep.subr.bf16.mxu0 %v565_v23 }
  0x37   :  { %533 = vmatpush3.bf16.msra.mxu0 %v565_v23 }
  0x38   :  { %534 = vmatprep.subr.bf16.mxu0 %v566_v39 }
  0x3b   :  { %535 = vmatpush3.bf16.msra.mxu0 %v566_v39 }
  0x3c   :  { %536 = vmatprep.subr.bf16.mxu0 %v567_v40 }
  0x3f   :  { %537 = vmatpush3.bf16.msra.mxu0 %v567_v40 }
  0xf5   :  { %v500_v25 = vpop.f32.mrb[0].mxu0 }
  0xf6   :  { %v157_v26 = vadd.f32 %v500_v25, %v423_v24  ;;  %v148_v27 = vpop.f32.mrb[1].mxu0 }
  0xf7   :  { %v149_v28 = vadd.f32 %v423_v24, %v148_v27  ;;  %v501_v29 = vpop.f32.mrb[2].mxu0 }
  0xf8   :  { %v160_v30 = vadd.f32 %v501_v29, %v423_v24  ;;  %v151_v31 = vpop.f32.mrb[3].mxu0  ;;  %v165_v33 = vmax.f32 %v157_v26, 0.0 }
  0xf9   :  { %v152_v32 = vadd.f32 %v423_v24, %v151_v31  ;;  %v163_v35 = vmax.f32 %v149_v28, 0.0 }
  0xfa   :  { %v166_v34 = vmax.f32 %v160_v30, 0.0 }
  0xfb   :  { %v164_v36 = vmax.f32 %v152_v32, 0.0 }
  0xfc   :  { %v168_v37 = vpack.c.bf16 %v166_v34, %v165_v33 }
  0xfd   :  { %v167_v38 = vpack.c.bf16 %v164_v36, %v163_v35 }
  0xff   :  { %518 = vmatprep.mubr.bf16.mxu1 %v167_v38 }
 0x100   :  { %519 = vmatmul.mubr.bf16.vlgmr.msra.gmra.mrb[0].mxu1 %v168_v37 }
 0x1d3   :  { %v520_v42 = vpop.f32.mrb[0].mxu1 }
 0x1d4   :  { %v283_v43 = vadd.f32 %v520_v42, %v434_v41  ;;  %v274_v44 = vpop.f32.mrb[1].mxu1 }
 0x1d5   :  { %v275_v45 = vadd.f32 %v434_v41, %v274_v44  ;;  %v521_v46 = vpop.f32.mrb[2].mxu1 }
 0x1d6   :  { %v286_v47 = vadd.f32 %v521_v46, %v434_v41  ;;  %v277_v48 = vpop.f32.mrb[3].mxu1  ;;  %v291_v50 = vmax.f32 %v283_v43, 0.0 }
 0x1d7   :  { %v278_v49 = vadd.f32 %v434_v41, %v277_v48  ;;  %v289_v52 = vmax.f32 %v275_v45, 0.0 }
 0x1d8   :  { %v292_v51 = vmax.f32 %v286_v47, 0.0 }
 0x1d9   :  { %v290_v53 = vmax.f32 %v278_v49, 0.0 }
 0x1da   :  { %v294_v54 = vpack.c.bf16 %v292_v51, %v291_v50 }
 0x1db   :  { %v293_v55 = vpack.c.bf16 %v290_v53, %v289_v52 }
 0x1dd   :  { %538 = vmatprep.mubr.bf16.mxu0 %v293_v55 }
 0x1de   :  { %539 = vmatmul.mubr.bf16.vlgmr.msra.gmra.mrb[4].mxu0 %v294_v54 }
 0x2b1   :  { %v540_v57 = vpop.f32.mrb[4].mxu0 }
 0x2b2   :  { %v409_v58 = vadd.f32 %v540_v57, %v443_v56  ;;  %v400_v59 = vpop.f32.mrb[5].mxu0 }
 0x2b3   :  { %v401_v60 = vadd.f32 %v443_v56, %v400_v59  ;;  %v541_v61 = vpop.f32.mrb[6].mxu0 }
 0x2b4   :  { %417 = vst [vmem:[%s714_s7 + $0x10] sm:$0xff] %v409_v58  ;;  %v412_v62 = vadd.f32 %v541_v61, %v443_v56  ;;  %v403_v63 = vpop.f32.mrb[7].mxu0 }
 0x2b5   :  { %415 = vst [vmem:[%s714_s7] sm:$0xff] %v401_v60  ;;  %v404_v0 = vadd.f32 %v443_v56, %v403_v63 }
 0x2b6   :  { %418 = vst [vmem:[%s714_s7 + $0x18] sm:$0xff] %v412_v62 }
 0x2b7   :  { %416 = vst [vmem:[%s714_s7 + $0x8] sm:$0xff] %v404_v0 }

</bundles_post_ra>
